<compile_context>
chip_gen: v5e
topology: v5e:2x2
jax: 0.10.0
libtpu: 0.0.40
codegen_flags: <defaults>
</compile_context>

<pallas_src>
import functools

import jax
import jax.numpy as jnp
from jax.experimental import pallas as pl
from jax.experimental.pallas import tpu as pltpu


def msconv_kernel(x_ref, w_ref, b_ref, o_ref, *, k_taps, l_out):
    """One (batch-block, C_out-tile) of the fused multi-scale conv + BN + ReLU.

    x_ref: (b_blk, L + k_taps - 1, C_in)  bf16, zero-padded halo on L
    w_ref: (k_taps * C_in, tn)            bf16, branches fused, BN folded,
                                          pre-transposed, tap-major rows
    b_ref: (1, tn)                        f32, conv bias with BN folded in
    o_ref: (b_blk, L, tn)                 f32 (or bf16)
    """
    b_blk, _, c_in = x_ref.shape
    tn = o_ref.shape[-1]
    rows = b_blk * l_out

    # Unrolled tap accumulate: no materialized im2col intermediate, no lane
    # concat.  Each tap reads a shifted window straight from x_ref and issues
    # one MXU matmul with f32 accumulation.
    acc = jnp.zeros((rows, tn), jnp.float32)
    for t in range(k_taps):
        xt = x_ref[:, pl.ds(t, l_out), :].reshape(rows, c_in)
        wt = w_ref[pl.ds(t * c_in, c_in), :]
        acc = acc + jnp.dot(xt, wt, preferred_element_type=jnp.float32)

    # Folded (conv bias + BatchNorm) affine, then ReLU — all in f32.
    y = jnp.maximum(acc + b_ref[...], 0.0)
    o_ref[...] = y.reshape(b_blk, l_out, tn).astype(o_ref.dtype)


def _round_up(v, m):
    return -(-v // m) * m


def _chip_tuning():
    """Per-generation (MXU N-tile multiple, vmem_limit_bytes)."""
    try:
        kind = jax.devices()[0].device_kind.lower()
    except Exception:
        kind = ""
    is_v5e = ("v5e" in kind) or ("v5 lite" in kind) or ("v5litepod" in kind)
    n_mult = 128 if is_v5e else 256            # v5e MXU 4x128^2; v6e/v7x 2x256^2
    is_v7 = "v7" in kind
    vmem_limit = (48 if is_v7 else 64) * 1024 * 1024   # v7x: 64 MiB physical VMEM
    return n_mult, vmem_limit


def _pick_batch_block(batch, rows_per_batch, per_batch_bytes, vmem_budget, grid_n):
    """Largest batch block whose per-step footprint fits the VMEM budget,
    capped near 4096 matmul rows, then shrunk (when the batch allows) to keep
    >= 4 total grid steps so both v7x TensorCores get pipelined work."""
    b_blk = max(1, min(batch,
                       vmem_budget // max(1, per_batch_bytes),
                       max(1, 4096 // max(1, rows_per_batch))))
    while b_blk > 1 and (-(-batch // b_blk)) * grid_n < 4:
        b_blk = max(1, b_blk // 2)
    return b_blk


def multi_scale_conv1d(x, params, *, kernel_sizes=(3, 5, 7), eps=1e-5,
                       out_dtype=jnp.float32):
    """x: (B, C_in, L) float32.  Returns (B, C_out, L) in out_dtype (PyTorch layout).

    out_dtype=jnp.bfloat16 halves the dominant HBM writeback stream (worth it
    on v5e/v6e when the consumer tolerates bf16)."""
    B, C_in, L = x.shape
    k_max = max(kernel_sizes)
    half = k_max // 2

    # ---- parameter fusion (wrapper-side, runs once; no in-kernel transposes) ----
    w_parts = []
    for w, k in zip(params["conv_w"], kernel_sizes):
        pad = (k_max - k) // 2                      # padding=k//2 keeps centres aligned
        w_parts.append(jnp.pad(w, ((0, 0), (0, 0), (pad, pad))))
    w_all = jnp.concatenate(w_parts, axis=0)        # (C_out, C_in, k_max)
    b_all = jnp.concatenate(params["conv_b"], axis=0)  # (C_out,)
    C_out = w_all.shape[0]

    # Fold eval-mode BatchNorm1d into a per-out-channel scale/shift.
    scale = params["gamma"] / jnp.sqrt(params["running_var"] + eps)
    shift = params["beta"] - params["running_mean"] * scale
    w_fused = w_all * scale[:, None, None]                       # (C_out, C_in, k_max)
    b_fused = (b_all * scale + shift).astype(jnp.float32)        # (C_out,)

    # ---- per-generation tuning ----
    n_mult, vmem_limit = _chip_tuning()

    # ---- lane-dense output: zero-pad C_out to a multiple of the MXU N width ----
    C_out_pad = _round_up(C_out, n_mult)
    tn = n_mult
    grid_n = C_out_pad // tn
    w_fused = jnp.pad(w_fused, ((0, C_out_pad - C_out), (0, 0), (0, 0)))
    b_fused = jnp.pad(b_fused, ((0, C_out_pad - C_out),)).reshape(1, C_out_pad)

    # Pre-transpose to (k_max*C_in, C_out_pad), tap-major rows matching the
    # in-kernel per-tap slices; cast MXU operands to bf16 (f32 accumulation).
    w_mat = jnp.transpose(w_fused, (2, 1, 0)).reshape(k_max * C_in, C_out_pad)
    w_mat = w_mat.astype(jnp.bfloat16)

    # ---- activation layout: channels-last, zero-padded halo on L, bf16 ----
    x_t = jnp.transpose(x, (0, 2, 1))                            # (B, L, C_in)
    x_pad = jnp.pad(x_t, ((0, 0), (half, half), (0, 0))).astype(jnp.bfloat16)
    L_pad = L + 2 * half

    # ---- batch-block sizing from VMEM budget ----
    out_bytes = jnp.dtype(out_dtype).itemsize
    per_batch_bytes = (2 * L_pad * C_in * 2        # x block, bf16, double-buffered
                       + 2 * L * tn * out_bytes    # out block, double-buffered
                       + L * tn * 4                # f32 accumulator
                       + L * C_in * 2)             # per-tap slice staging
    b_blk = _pick_batch_block(B, L, per_batch_bytes, vmem_limit // 2, grid_n)

    grid_b = -(-B // b_blk)
    B_pad = grid_b * b_blk
    if B_pad != B:                                 # handle non-divisor batch sizes
        x_pad = jnp.pad(x_pad, ((0, B_pad - B), (0, 0), (0, 0)))

    flops = 2 * B_pad * L * (k_max * C_in) * C_out_pad
    bytes_accessed = (B_pad * L_pad * C_in * 2
                      + int(w_mat.size) * 2
                      + int(b_fused.size) * 4
                      + B_pad * L * C_out_pad * out_bytes)

    kernel = functools.partial(msconv_kernel, k_taps=k_max, l_out=L)

    out = pl.pallas_call(
        kernel,
        out_shape=jax.ShapeDtypeStruct((B_pad, L, C_out_pad), out_dtype),
        grid_spec=pltpu.PrefetchScalarGridSpec(
            num_scalar_prefetch=0,
            grid=(grid_b, grid_n),                 # j innermost: x block stays resident
            in_specs=[
                pl.BlockSpec((b_blk, L_pad, C_in), lambda i, j: (i, 0, 0)),   # activations
                pl.BlockSpec((k_max * C_in, tn), lambda i, j: (0, j)),        # fused weight
                pl.BlockSpec((1, tn), lambda i, j: (0, j)),                   # fused bias
            ],
            out_specs=pl.BlockSpec((b_blk, L, tn), lambda i, j: (i, 0, j)),
        ),
        compiler_params=pltpu.CompilerParams(
            dimension_semantics=("parallel", "parallel"),
            vmem_limit_bytes=vmem_limit,
        ),
        cost_estimate=pl.CostEstimate(flops=int(flops), transcendentals=0,
                                      bytes_accessed=int(bytes_accessed)),
    )(x_pad, w_mat, b_fused)

    # Drop batch / channel padding (pad channels are exactly zero after ReLU),
    # back to PyTorch's (B, C_out, L) layout.
    out = out[:B, :, :C_out]
    return jnp.transpose(out, (0, 2, 1))


def init_params(key, in_channels, out_channels, kernel_sizes=(3, 5, 7)):
    """Deterministic synthetic parameters matching the torch module's structure."""
    n = len(kernel_sizes)
    c_branch = out_channels // n
    keys = jax.random.split(key, 2 * n)
    conv_w, conv_b = [], []
    for i, k in enumerate(kernel_sizes):
        bound = 1.0 / (in_channels * k) ** 0.5      # torch Conv1d default init bound
        conv_w.append(jax.random.uniform(keys[2 * i], (c_branch, in_channels, k),
                                         jnp.float32, -bound, bound))
        conv_b.append(jax.random.uniform(keys[2 * i + 1], (c_branch,),
                                         jnp.float32, -bound, bound))
    return {
        "conv_w": conv_w,
        "conv_b": conv_b,
        "gamma": jnp.ones((out_channels,), jnp.float32),
        "beta": jnp.zeros((out_channels,), jnp.float32),
        "running_mean": jnp.zeros((out_channels,), jnp.float32),
        "running_var": jnp.ones((out_channels,), jnp.float32),
    }


def reference_forward(x, params, kernel_sizes=(3, 5, 7), eps=1e-5):
    """Pure-JAX f32 reference with identical (eval-mode) semantics."""
    outs = []
    for w, b, k in zip(params["conv_w"], params["conv_b"], kernel_sizes):
        y = jax.lax.conv_general_dilated(
            x, w, window_strides=(1,), padding=[(k // 2, k // 2)],
            dimension_numbers=("NCH", "OIH", "NCH"))
        outs.append(y + b[None, :, None])
    y = jnp.concatenate(outs, axis=1)
    scale = params["gamma"] / jnp.sqrt(params["running_var"] + eps)
    shift = params["beta"] - params["running_mean"] * scale
    y = y * scale[None, :, None] + shift[None, :, None]
    return jnp.maximum(y, 0.0)


if __name__ == "__main__":
    B, C_IN, L = 2, 4, 16
    C_OUT = 12                     # divisible by len(kernel_sizes)=3
    KS = (3, 5, 7)

    key = jax.random.PRNGKey(0)
    k_x, k_p = jax.random.split(key)
    x = jax.random.normal(k_x, (B, C_IN, L), dtype=jnp.float32)
    params = init_params(k_p, C_IN, C_OUT, KS)

    out = multi_scale_conv1d(x, params, kernel_sizes=KS)
    jax.block_until_ready(out)

    ref = reference_forward(x, params, KS)

    assert out.shape == (B, C_OUT, L)
    assert bool(jnp.all(jnp.isfinite(out)))
    # bf16 MXU inputs vs f32 reference: loose absolute tolerance.
    max_err = float(jnp.max(jnp.abs(out.astype(jnp.float32) - ref)))
    assert max_err < 0.2, f"max abs error vs reference too large: {max_err}"
    print("KERNEL_OK")
</pallas_src>

<mosaic_0001>
module attributes {stable_mosaic.version = 11 : i64} {
  func.func @msconv_kernel(%arg0: i32, %arg1: i32, %arg2: memref<1x22x4xbf16, #tpu.memory_space<vmem>>, %arg3: memref<28x256xbf16, #tpu.memory_space<vmem>>, %arg4: memref<1x256xf32, #tpu.memory_space<vmem>>, %arg5: memref<1x16x256xf32, #tpu.memory_space<vmem>>) attributes {dimension_semantics = [#tpu.dimension_semantics<parallel>, #tpu.dimension_semantics<parallel>], iteration_bounds = array<i64: 2, 1>, scalar_prefetch = 0 : i64, scratch_operands = 0 : i64, tpu.core_type = #tpu.core_type<tc>, window_params = [{transform_indices = @transform_0, window_bounds = array<i64: 1, 22, 4>}, {transform_indices = @transform_1, window_bounds = array<i64: 28, 256>}, {transform_indices = @transform_2, window_bounds = array<i64: 1, 256>}, {transform_indices = @transform_3, window_bounds = array<i64: 1, 16, 256>}]} {
    %cst = arith.constant 0.000000e+00 : f32
    %0 = vector.broadcast %cst : f32 to vector<16x256xf32>
    %c0 = arith.constant 0 : index
    %c0_0 = arith.constant 0 : index
    %c0_1 = arith.constant 0 : index
    %1 = vector.load %arg2[%c0, %c0_0, %c0_1] : memref<1x22x4xbf16, #tpu.memory_space<vmem>>, vector<1x16x4xbf16>
    %2 = vector.shape_cast %1 : vector<1x16x4xbf16> to vector<16x4xbf16>
    %c0_2 = arith.constant 0 : index
    %c0_3 = arith.constant 0 : index
    %3 = vector.load %arg3[%c0_2, %c0_3] : memref<28x256xbf16, #tpu.memory_space<vmem>>, vector<4x256xbf16>
    %cst_4 = arith.constant dense<0.000000e+00> : vector<16x256xf32>
    %4 = tpu.matmul %2, %3, %cst_4 {dimension_numbers = #tpu.dot_dimension_numbers<[1], [0], [0], [1], [0, 0, 1, 1], [], []>} : vector<16x4xbf16>, vector<4x256xbf16>, vector<16x256xf32> -> vector<16x256xf32>
    %5 = arith.addf %0, %4 : vector<16x256xf32>
    %c0_5 = arith.constant 0 : index
    %c1 = arith.constant 1 : index
    %c0_6 = arith.constant 0 : index
    %6 = vector.load %arg2[%c0_5, %c1, %c0_6] : memref<1x22x4xbf16, #tpu.memory_space<vmem>>, vector<1x16x4xbf16>
    %7 = vector.shape_cast %6 : vector<1x16x4xbf16> to vector<16x4xbf16>
    %c4 = arith.constant 4 : index
    %c0_7 = arith.constant 0 : index
    %8 = vector.load %arg3[%c4, %c0_7] : memref<28x256xbf16, #tpu.memory_space<vmem>>, vector<4x256xbf16>
    %cst_8 = arith.constant dense<0.000000e+00> : vector<16x256xf32>
    %9 = tpu.matmul %7, %8, %cst_8 {dimension_numbers = #tpu.dot_dimension_numbers<[1], [0], [0], [1], [0, 0, 1, 1], [], []>} : vector<16x4xbf16>, vector<4x256xbf16>, vector<16x256xf32> -> vector<16x256xf32>
    %10 = arith.addf %5, %9 : vector<16x256xf32>
    %c0_9 = arith.constant 0 : index
    %c2 = arith.constant 2 : index
    %c0_10 = arith.constant 0 : index
    %11 = vector.load %arg2[%c0_9, %c2, %c0_10] : memref<1x22x4xbf16, #tpu.memory_space<vmem>>, vector<1x16x4xbf16>
    %12 = vector.shape_cast %11 : vector<1x16x4xbf16> to vector<16x4xbf16>
    %c8 = arith.constant 8 : index
    %c0_11 = arith.constant 0 : index
    %13 = vector.load %arg3[%c8, %c0_11] : memref<28x256xbf16, #tpu.memory_space<vmem>>, vector<4x256xbf16>
    %cst_12 = arith.constant dense<0.000000e+00> : vector<16x256xf32>
    %14 = tpu.matmul %12, %13, %cst_12 {dimension_numbers = #tpu.dot_dimension_numbers<[1], [0], [0], [1], [0, 0, 1, 1], [], []>} : vector<16x4xbf16>, vector<4x256xbf16>, vector<16x256xf32> -> vector<16x256xf32>
    %15 = arith.addf %10, %14 : vector<16x256xf32>
    %c0_13 = arith.constant 0 : index
    %c3 = arith.constant 3 : index
    %c0_14 = arith.constant 0 : index
    %16 = vector.load %arg2[%c0_13, %c3, %c0_14] : memref<1x22x4xbf16, #tpu.memory_space<vmem>>, vector<1x16x4xbf16>
    %17 = vector.shape_cast %16 : vector<1x16x4xbf16> to vector<16x4xbf16>
    %c12 = arith.constant 12 : index
    %c0_15 = arith.constant 0 : index
    %18 = vector.load %arg3[%c12, %c0_15] : memref<28x256xbf16, #tpu.memory_space<vmem>>, vector<4x256xbf16>
    %cst_16 = arith.constant dense<0.000000e+00> : vector<16x256xf32>
    %19 = tpu.matmul %17, %18, %cst_16 {dimension_numbers = #tpu.dot_dimension_numbers<[1], [0], [0], [1], [0, 0, 1, 1], [], []>} : vector<16x4xbf16>, vector<4x256xbf16>, vector<16x256xf32> -> vector<16x256xf32>
    %20 = arith.addf %15, %19 : vector<16x256xf32>
    %c0_17 = arith.constant 0 : index
    %c4_18 = arith.constant 4 : index
    %c0_19 = arith.constant 0 : index
    %21 = vector.load %arg2[%c0_17, %c4_18, %c0_19] : memref<1x22x4xbf16, #tpu.memory_space<vmem>>, vector<1x16x4xbf16>
    %22 = vector.shape_cast %21 : vector<1x16x4xbf16> to vector<16x4xbf16>
    %c16 = arith.constant 16 : index
    %c0_20 = arith.constant 0 : index
    %23 = vector.load %arg3[%c16, %c0_20] : memref<28x256xbf16, #tpu.memory_space<vmem>>, vector<4x256xbf16>
    %cst_21 = arith.constant dense<0.000000e+00> : vector<16x256xf32>
    %24 = tpu.matmul %22, %23, %cst_21 {dimension_numbers = #tpu.dot_dimension_numbers<[1], [0], [0], [1], [0, 0, 1, 1], [], []>} : vector<16x4xbf16>, vector<4x256xbf16>, vector<16x256xf32> -> vector<16x256xf32>
    %25 = arith.addf %20, %24 : vector<16x256xf32>
    %c0_22 = arith.constant 0 : index
    %c5 = arith.constant 5 : index
    %c0_23 = arith.constant 0 : index
    %26 = vector.load %arg2[%c0_22, %c5, %c0_23] : memref<1x22x4xbf16, #tpu.memory_space<vmem>>, vector<1x16x4xbf16>
    %27 = vector.shape_cast %26 : vector<1x16x4xbf16> to vector<16x4xbf16>
    %c20 = arith.constant 20 : index
    %c0_24 = arith.constant 0 : index
    %28 = vector.load %arg3[%c20, %c0_24] : memref<28x256xbf16, #tpu.memory_space<vmem>>, vector<4x256xbf16>
    %cst_25 = arith.constant dense<0.000000e+00> : vector<16x256xf32>
    %29 = tpu.matmul %27, %28, %cst_25 {dimension_numbers = #tpu.dot_dimension_numbers<[1], [0], [0], [1], [0, 0, 1, 1], [], []>} : vector<16x4xbf16>, vector<4x256xbf16>, vector<16x256xf32> -> vector<16x256xf32>
    %30 = arith.addf %25, %29 : vector<16x256xf32>
    %c0_26 = arith.constant 0 : index
    %c6 = arith.constant 6 : index
    %c0_27 = arith.constant 0 : index
    %31 = vector.load %arg2[%c0_26, %c6, %c0_27] : memref<1x22x4xbf16, #tpu.memory_space<vmem>>, vector<1x16x4xbf16>
    %32 = vector.shape_cast %31 : vector<1x16x4xbf16> to vector<16x4xbf16>
    %c24 = arith.constant 24 : index
    %c0_28 = arith.constant 0 : index
    %33 = vector.load %arg3[%c24, %c0_28] : memref<28x256xbf16, #tpu.memory_space<vmem>>, vector<4x256xbf16>
    %cst_29 = arith.constant dense<0.000000e+00> : vector<16x256xf32>
    %34 = tpu.matmul %32, %33, %cst_29 {dimension_numbers = #tpu.dot_dimension_numbers<[1], [0], [0], [1], [0, 0, 1, 1], [], []>} : vector<16x4xbf16>, vector<4x256xbf16>, vector<16x256xf32> -> vector<16x256xf32>
    %35 = arith.addf %30, %34 : vector<16x256xf32>
    %c0_30 = arith.constant 0 : index
    %c0_31 = arith.constant 0 : index
    %36 = vector.load %arg4[%c0_30, %c0_31] : memref<1x256xf32, #tpu.memory_space<vmem>>, vector<1x256xf32>
    %37 = vector.broadcast %36 : vector<1x256xf32> to vector<16x256xf32>
    %38 = arith.addf %35, %37 : vector<16x256xf32>
    %cst_32 = arith.constant 0.000000e+00 : f32
    %39 = vector.broadcast %cst_32 : f32 to vector<16x256xf32>
    %40 = arith.maximumf %38, %39 : vector<16x256xf32>
    %41 = vector.shape_cast %40 : vector<16x256xf32> to vector<1x16x256xf32>
    %c0_33 = arith.constant 0 : index
    %c0_34 = arith.constant 0 : index
    %c0_35 = arith.constant 0 : index
    %42 = vector.load %arg5[%c0_33, %c0_34, %c0_35] : memref<1x16x256xf32, #tpu.memory_space<vmem>>, vector<1x16x256xf32>
    tpu.vector_store %arg5[%c0_33, %c0_34, %c0_35], %41 {strides = array<i32>} : memref<1x16x256xf32, #tpu.memory_space<vmem>>, vector<1x16x256xf32>,
    return
  }
  func.func @transform_0(%arg0: i32, %arg1: i32) -> (i32, i32, i32) {
    %c0_i32 = arith.constant 0 : i32
    %c0_i32_0 = arith.constant 0 : i32
    %c0_i32_1 = arith.constant 0 : i32
    return %arg0, %c0_i32, %c0_i32_0 : i32, i32, i32
  }
  func.func @transform_1(%arg0: i32, %arg1: i32) -> (i32, i32) {
    %c0_i32 = arith.constant 0 : i32
    %c0_i32_0 = arith.constant 0 : i32
    return %c0_i32, %arg1 : i32, i32
  }
  func.func @transform_2(%arg0: i32, %arg1: i32) -> (i32, i32) {
    %c0_i32 = arith.constant 0 : i32
    %c0_i32_0 = arith.constant 0 : i32
    return %c0_i32, %arg1 : i32, i32
  }
  func.func @transform_3(%arg0: i32, %arg1: i32) -> (i32, i32, i32) {
    %c0_i32 = arith.constant 0 : i32
    %c0_i32_0 = arith.constant 0 : i32
    return %arg0, %c0_i32, %arg1 : i32, i32, i32
  }
}

</mosaic_0001>

<bundles_post_ra>
// kernel: tpu_custom_call.1
= control target key start
LH: loop header
LB: loop body
LE: loop exit
PB: predicated region body
PF: predicated region fallthrough
CT: control target
= control target key end

     0   :  { %8 = vsyncpa [#allocation3], 0  ;;  %s1188_s0 = inlined_call_operand.vmem [shape: bf16[2,22,4], index: 0, kind: input, shape index: {}]   ;;  %s1189_s1 = inlined_call_operand.hbm [shape: bf16[28,256], index: 1, kind: input, shape index: {}]   ;;  %s1190_s2 = inlined_call_operand.vmem [shape: f32[1,256], index: 2, kind: input, shape index: {}]   ;;  %s1191_s3 = inlined_call_operand.hbm [shape: f32[2,16,256], index: 3, kind: output, shape index: {}]  }
   0x1   :  { %9 = vsyncpa [#allocation4], 0 }
   0x2   :  { %11 = vsyncpa [#allocation4 + $0x1], 0  ;;  %s1029_s12 = smov 0   ;;  %s1031_s13 = smov 0  }
   0x3   :  { %s1033_s14 = smov 0   ;;  %s1035_s15 = smov 0  }
   0x4   :  { %s1037_s16 = smov 0   ;;  %s1039_s17 = smov 0  }
   0x5 LB: > { %s785_s18 = sadd.s32 4294967295, %s1002_s17   ;;  %s786_s19 = sadd.s32 4294967294, %s1002_s17   ;;  %s1002_s17 = sphi %s1039_s17, %s17_s17   ;;  %s998_s16 = sphi %s1037_s16, %s1198_s16   ;;  %s994_s15 = sphi %s1035_s15, %s1197_s15   ;;  %s990_s14 = sphi %s1033_s14, %s1196_s14   ;;  %s986_s13 = sphi %s1031_s13, %s1195_s13   ;;  %s982_s12 = sphi %s1029_s12, %s1194_s12  }
   0x6   : > { %s29_s20 = sadd.s32 1, %s998_s16  ;;  %s116_s21 = sadd.s32 1, %s990_s14 }
   0x7   : > { %p31_p0 = scmp.ge.s32.totalorder %s29_s20, 2  ;;  %p126_p1 = scmp.ne.s32.totalorder %s990_s14, %s986_s13 }
   0x8   : > { %p127_p2 = scmp.eq.s32.totalorder %s785_s18, 1  ;;  %p132_p3 = scmp.ne.s32.totalorder %s986_s13, %s982_s12 }
   0x9   : > { %s1200_s20 = smov (%p31_p0, %s29_s20), 0  ;;  %p133_p5 = scmp.eq.s32.totalorder %s786_s19, 1 }
   0xa   : > { %p1069_p4 = por %p127_p2, %p126_p1  ;;  %s111_s23 = ssub.s32 %s998_s16, %s1200_s20 }
   0xb   : > { %p787_p6 = scmp.ge.s32.totalorder %s1002_s17, 1  ;;  %p114_p7 = scmp.eq.s32.totalorder %s111_s23, 0 }
   0xc   : > { %p1076_p8 = por %p133_p5, %p132_p3  ;;  %p140_p9 = scmp.lt.s32.totalorder %s1002_s17, 3 }
   0xd   : > { %s1082_s25 = scalar_select %p114_p7, %s990_s14, %s116_s21  }
   0xe   : > { %p141_p10 = pnand %p787_p6, %p140_p9  ;;  %p834_p11 = scmp.eq.s32.totalorder %s785_s18, 0 }
   0xf   : > { %s154_s28 = sshll.u32 %s1189_s1, 4  ;;  %s1004_s29 = smov [#allocation2]   ;;  %s155_s28 = int_to_ptr.hbm [resolvable:$true] %s154_s28 }
  0x10   : > { %p826_p12 = pneg %p141_p10  ;;  %s156_s30 = sshll.u32 %s1004_s29, 4  ;;  %s157_s30 = int_to_ptr.vmem [resolvable:$true] %s156_s30 }
  0x11   : > { %s1005_s4 = smov 128   ;;  %s1006_s5 = smov 8  }
  0x12   : > { %p827_p13 = pnand %p834_p11, %p826_p12  ;;  %188 = sbr.rel (%p141_p10) target bundleno = 234 (0xea), region = 32 }
  0x14   : > { %829 = dma.hbm_to_vmem [thread:$0]  (!%p827_p13), %s155_s28, 512, %s157_s30, [#allocation3], %s1005_s4, %s1005_s4, %s1006_s5  }
  0x17   : > { %973 = dma.done.wait (%p834_p11), [#allocation3], 512  }
  0x18   : > { %975 = vsyncadd (%p834_p11), [#allocation3], 4294966784  ;;  %p217_p0 = scmp.lt.s32.totalorder %s994_s15, 1  ;;  %v232_v0 = vld [vmem:[#allocation2] sm:$0x33]  ;;  %vm267_vm0 = vcmask 1041408  }
  0x19   : > { %v234_v1 = vld [vmem:[#allocation2] sm:$0xcc]  ;;  %v303_v2 = vunpack.c.l.b16 %v232_v0  ;;  %v304_v3 = vunpack.c.h.b16 %v232_v0  ;;  %v344_v8 = vld [vmem:[#allocation2 + $0x8] sm:$0x33]  ;;  %vm263_vm1 = vcmask 31744   ;;  %vm348_vm4 = vcmask 1046528  }
  0x1a   : > { %s218_s6 = scalar_select %p217_p0, %s994_s15, 1  ;;  %v257_v4 = vunpack.c.l.b16 %v234_v1  ;;  %v258_v5 = vunpack.c.h.b16 %v234_v1  ;;  %vm243_vm2 = vsmask.f32 7424  ;;  %v353_v18 = vunpack.c.l.b16 %v344_v8  ;;  %v399_v19 = vld [vmem:[#allocation2 + $0x8] sm:$0xcc] }
  0x1b   : > { %v305_v11 = vpack.c.b16 %v303_v2, %v303_v2  ;;  %v306_v12 = vpack.c.b16 %v304_v3, %v304_v3  ;;  %v354_v27 = vunpack.c.h.b16 %v344_v8  ;;  %v422_v32 = vunpack.c.l.b16 %v399_v19  ;;  %v470_v34 = vld [vmem:[#allocation2 + $0x10] sm:$0x33]  ;;  %v525_v43 = vld [vmem:[#allocation2 + $0x10] sm:$0xcc]  ;;  %s214_s19 = sand.u32 1, %s986_s13   ;;  %s814_s23 = sshll.u32 %s994_s15, 5 }
  0x1c   : > { %s819_s7 = smul.u32 12, %s218_s6  ;;  %v259_v13 = vpack.c.b16 %v257_v4, %v257_v4  ;;  %v260_v14 = vpack.c.b16 %v258_v5, %v258_v5  ;;  %v355_v26 = vpack.c.b16 %v353_v18, %v353_v18  ;;  %v423_v33 = vunpack.c.h.b16 %v399_v19  ;;  %s793_s21 = sshll.u32 %s214_s19, 5 }
  0x1d   : > { %v310_v20 = vsel %vm267_vm0, %v305_v11, 0  ;;  %v313_v21 = vsel %vm267_vm0, %v306_v12, 0  ;;  %v356_v38 = vpack.c.b16 %v354_v27, %v354_v27  ;;  %v424_v39 = vpack.c.b16 %v422_v32, %v422_v32  ;;  %s216_s26 = scalar_lea.vmem [#allocation5], %s793_s21  ;;  %s682_s29 = scalar_lea.hbm %s1191_s3, %s814_s23 }
  0x1e   : > { %s1092_s10 = scalar_lea.vmem %s1188_s0, %s819_s7  ;;  %v261_v22 = vrot.slane %v259_v13, 2  ;;  %v262_v23 = vrot.slane %v260_v14, 2  ;;  %322 = vmatpush.bf16.msra.mxu2 %v310_v20  ;;  %336 = vmatpush.bf16.msra.mxu3 %v313_v21  ;;  %v361_v37 = vsel %vm267_vm0, %v355_v26, 0  ;;  %v425_v40 = vpack.c.b16 %v423_v33, %v423_v33  ;;  %s683_s15 = sshll.u32 %s216_s26, 4  ;;  %s684_s15 = int_to_ptr.vmem [resolvable:$true] %s683_s15 }
  0x1f   : > { %v816_v6 = vld [vmem:[%s1092_s10] sm:$0xff]   ;;  %v233_v7 = vld [vmem:[%s1092_s10 + $0x8] sm:$0x1]  ;;  %v364_v45 = vsel %vm267_vm0, %v356_v38, 0  ;;  %v479_v46 = vunpack.c.l.b16 %v470_v34  ;;  %v426_v47 = vrot.slane %v424_v39, 2  ;;  %v480_v52 = vunpack.c.h.b16 %v470_v34  ;;  %s685_s30 = sshll.u32 %s682_s29, 4  ;;  %s686_s30 = int_to_ptr.hbm [resolvable:$true] %s685_s30 }
  0x20   : > { %v1096_v9 = vunpack.c.h.b16 %v816_v6  ;;  %v240_v10 = vunpack.c.l.b16 %v233_v7  ;;  %v245_v16 = vshrl.u32 %v816_v6, 16  ;;  %v247_v17 = vshll.u32 %v816_v6, 16  ;;  %v343_v28 = vld [vmem:[%s1092_s10] sm:$0xe]  ;;  %v398_v29 = vld [vmem:[%s1092_s10 + $0x8] sm:$0x3] }
  0x21   : > { %v269_v30 = vsel %vm267_vm0, %v261_v22, 0  ;;  %v272_v31 = vsel %vm267_vm0, %v262_v23, 0  ;;  %797 = vmatmul.msk.bf16.vlgmr.msra.gmra.mxu2 %vm263_vm1, %v816_v6  ;;  %798 = vmatmul.msk.bf16.vlgmr.msra.gmra.mxu3 %vm263_vm1, %v816_v6  ;;  %v346_v41 = vunpack.c.l.b16 %v343_v28  ;;  %v401_v42 = vunpack.c.l.b16 %v398_v29  ;;  %v469_v59 = vld [vmem:[%s1092_s10] sm:$0xc]  ;;  %v524_v3 = vld [vmem:[%s1092_s10 + $0x8] sm:$0x7] }
  0x22   : > { %v1098_v15 = vpack.c.b16 %v240_v10, %v240_v10  ;;  %v249_v24 = vrot.slane %v247_v17, 1  ;;  %281 = vmatpush.bf16.msra.mxu0 %v269_v30  ;;  %295 = vmatpush.bf16.msra.mxu1 %v272_v31  ;;  %v427_v48 = vrot.slane %v425_v40, 2  ;;  %v481_v51 = vpack.c.b16 %v479_v46, %v479_v46  ;;  %s669_s4 = scalar_lea.sflag [#allocation4], %s214_s19  ;;  %s934_s5 = sshra.s32 %s686_s30, 4  ;;  %s935_s5 = int_to_ptr.hbm [resolvable:$true] %s934_s5 }
  0x23   : > { %v347_v49 = vpack.c.b16 %v1096_v9, %v346_v41  ;;  %v1115_v50 = vpack.c.b16 %v401_v42, %v401_v42  ;;  %v548_v53 = vunpack.c.l.b16 %v525_v43  ;;  %v549_v54 = vunpack.c.h.b16 %v525_v43  ;;  %s936_s6 = scalar_lea.hbm %s935_s5, 32  ;;  %s940_s9 = scalar_lea.hbm %s1191_s3, 64 }
  0x24   : > { %v252_v25 = vshll.u32 %v1098_v15, 16  ;;  %v250_v35 = vor.u32 %v249_v24, %v245_v16  ;;  %v432_v55 = vsel %vm267_vm0, %v426_v47, 0  ;;  %v435_v56 = vsel %vm267_vm0, %v427_v48, 0  ;;  %v596_v16 = vld [vmem:[#allocation2 + $0x18] sm:$0x33]  ;;  %p937_p1 = scmp.ne.s32.totalorder %s935_s5, %s936_s6  ;;  %p941_p5 = scmp.lt.s32.totalorder %s935_s5, %s1191_s3 }
  0x25   : > { %v405_v57 = vshrl.u32 %v347_v49, 16  ;;  %v408_v58 = vshll.u32 %v347_v49, 16  ;;  %444 = vmatpush.bf16.msrb.mxu2 %v432_v55  ;;  %458 = vmatpush.bf16.msrb.mxu3 %v435_v56  ;;  %v413_v60 = vshrl.u32 %v1115_v50, 16  ;;  %v416_v61 = vshll.u32 %v1115_v50, 16  ;;  %p942_p6 = scmp.lt.s32.totalorder %s940_s9, %s936_s6 }
  0x26   : > { %v254_v36 = vrot.slane %v252_v25, 1  ;;  %373 = vmatpush.bf16.msrb.mxu0 %v361_v37  ;;  %387 = vmatpush.bf16.msrb.mxu1 %v364_v45  ;;  %v487_v62 = vsel %vm267_vm0, %v481_v51, 0  ;;  %v482_v1 = vpack.c.b16 %v480_v52, %v480_v52  ;;  %v550_v2 = vpack.c.b16 %v548_v53, %v548_v53  ;;  %p938_p2 = pnand %p937_p1, %p1069_p4 }
  0x27   : > { %v407_v63 = vrot.slane %v405_v57, 1  ;;  %v410_v0 = vrot.slane %v408_v58, 2  ;;  %v415_v4 = vrot.slane %v413_v60, 1  ;;  %v418_v5 = vrot.slane %v416_v61, 2  ;;  %p943_p7 = por %p942_p6, %p941_p5 }
  0x28   : > { %v255_v44 = vsel %vm243_vm2, %v250_v35, %v254_v36  ;;  %v551_v6 = vpack.c.b16 %v549_v54, %v549_v54  ;;  %v472_v7 = vunpack.c.l.b16 %v469_v59  ;;  %v490_v8 = vsel %vm267_vm0, %v482_v1, 0  ;;  %p939_p3 = pneg %p938_p2 }
  0x29   : > { %795 = vmatmul.msk.bf16.vlgmr.msra.gmra.mxu0 %vm263_vm1, %v255_v44  ;;  %796 = vmatmul.msk.bf16.vlgmr.msra.gmra.mxu1 %vm263_vm1, %v255_v44  ;;  %v552_v10 = vrot.slane %v550_v2, 2  ;;  %v411_v11 = vor.u32 %v410_v0, %v407_v63  ;;  %v419_v12 = vor.u32 %v418_v5, %v415_v4  ;;  %v527_v14 = vunpack.c.l.b16 %v524_v3  ;;  %v595_v44 = vld [vmem:[%s1092_s10] sm:$0x8] }
  0x2a   : > { %499 = vmatpush.bf16.msra.mxu0 %v487_v62  ;;  %513 = vmatpush.bf16.msra.mxu1 %v490_v8  ;;  %v553_v13 = vrot.slane %v551_v6, 2  ;;  %vm403_vm3 = vsmask.f32 6400  ;;  %v349_v18 = vrot.slane %v347_v49, 1  ;;  %v350_v19 = vrot.slane %v1098_v15, 1  ;;  %p944_p9 = pnand %p943_p7, %p939_p3 }
  0x2b   : > { %v558_v17 = vsel %vm267_vm0, %v552_v10, 0  ;;  %v473_v21 = vpack.c.b16 %v1096_v9, %v472_v7  ;;  %v605_v22 = vunpack.c.l.b16 %v596_v16  ;;  %v420_v23 = vsel %vm403_vm3, %v411_v11, %v419_v12 }
  0x2c   : > { %570 = vmatpush.bf16.msra.mxu2 %v558_v17  ;;  %v561_v20 = vsel %vm267_vm0, %v553_v13, 0  ;;  %v528_v24 = vpack.c.b16 %v527_v14, %v527_v14  ;;  %v606_v25 = vunpack.c.h.b16 %v596_v16  ;;  %v351_v27 = vsel %vm348_vm4, %v349_v18, %v350_v19  ;;  %v650_v14 = vld [vmem:[%s1190_s2] sm:$0x3] }
  0x2d   : > { %584 = vmatpush.bf16.msra.mxu3 %v561_v20  ;;  %v607_v26 = vpack.c.b16 %v605_v22, %v605_v22  ;;  %v531_v29 = vshrl.u32 %v473_v21, 16  ;;  %v534_v30 = vshll.u32 %v473_v21, 16  ;;  %vm529_vm5 = vsmask.f32 5376 }
  0x2e   : > { %v608_v28 = vpack.c.b16 %v606_v25, %v606_v25  ;;  %v539_v31 = vshrl.u32 %v528_v24, 16  ;;  %v542_v32 = vshll.u32 %v528_v24, 16  ;;  %v475_v40 = vrot.slane %v473_v21, 2 }
  0x2f   : > { %v613_v15 = vsel %vm267_vm0, %v607_v26, 0  ;;  %v533_v34 = vrot.slane %v531_v29, 2  ;;  %v536_v35 = vrot.slane %v534_v30, 3  ;;  %v476_v41 = vrot.slane %v1115_v50, 2 }
  0x30   : > { %v616_v33 = vsel %vm267_vm0, %v608_v28, 0  ;;  %v541_v36 = vrot.slane %v539_v31, 2  ;;  %v544_v37 = vrot.slane %v542_v32, 3  ;;  %vm474_vm6 = vcmask 1045504  }
  0x31   : > { %801 = vmatmul.msk.bf16.vlgmr.msrb.gmra.mxu2 %vm263_vm1, %v420_v23  ;;  %802 = vmatmul.msk.bf16.vlgmr.msrb.gmra.mxu3 %vm263_vm1, %v420_v23  ;;  %v537_v38 = vor.u32 %v536_v35, %v533_v34  ;;  %v477_v43 = vsel %vm474_vm6, %v475_v40, %v476_v41  ;;  %v598_v45 = vunpack.c.l.b16 %v595_v44  ;;  %v602_v48 = vrot.slane %v528_v24, 3 }
  0x32   : > { %v545_v39 = vor.u32 %v544_v37, %v541_v36  ;;  %vm600_vm7 = vcmask 1044480   ;;  %v652_v22 = vperm.slane %v650_v14, 0  ;;  %v653_v23 = vperm.slane %v650_v14, 1 }
  0x33   : > { %v599_v46 = vpack.c.b16 %v1096_v9, %v598_v45 }
  0x34   : > { %v546_v42 = vsel %vm529_vm5, %v537_v38, %v545_v39 }
  0x35   : > { %v601_v47 = vrot.slane %v599_v46, 3 }
  0x37   : > { %v603_v49 = vsel %vm600_vm7, %v601_v47, %v602_v48 }
  0x39   : > { %799 = vmatmul.msk.bf16.vlgmr.msrb.gmra.mxu0 %vm263_vm1, %v351_v27  ;;  %800 = vmatmul.msk.bf16.vlgmr.msrb.gmra.mxu1 %vm263_vm1, %v351_v27 }
  0x3a   : > { %625 = vmatpush.bf16.msrb.mxu0 %v613_v15  ;;  %639 = vmatpush.bf16.msrb.mxu1 %v616_v33 }
  0x41   : > { %805 = vmatmul.msk.bf16.vlgmr.msra.gmra.mxu2 %vm263_vm1, %v546_v42  ;;  %806 = vmatmul.msk.bf16.vlgmr.msra.gmra.mxu3 %vm263_vm1, %v546_v42 }
  0x49   : > { %803 = vmatmul.msk.bf16.vlgmr.msra.gmra.mxu0 %vm263_vm1, %v477_v43  ;;  %804 = vmatmul.msk.bf16.vlgmr.msra.gmra.mxu1 %vm263_vm1, %v477_v43 }
  0x59   : > { %807 = vmatmul.msk.bf16.vlgmr.msrb.gmra.mxu0 %vm263_vm1, %v603_v49  ;;  %808 = vmatmul.msk.bf16.vlgmr.msrb.gmra.mxu1 %vm263_vm1, %v603_v49 }
  0xa4   : > { %v324_v52 = vpop.f32.mrf.mxu2  ;;  %v338_v53 = vpop.f32.mrf.mxu3 }
  0xa6   : > { %v283_v50 = vpop.f32.mrf.mxu0  ;;  %v297_v51 = vpop.f32.mrf.mxu1 }
  0xa7   : > { %v325_v3 = vadd.f32 %v324_v52, %v283_v50  ;;  %v339_v4 = vadd.f32 %v338_v53, %v297_v51 }
  0xac   : > { %v326_v56 = vpop.f32.mrf.mxu2  ;;  %v340_v57 = vpop.f32.mrf.mxu3 }
  0xae   : > { %v285_v54 = vpop.f32.mrf.mxu0  ;;  %v299_v55 = vpop.f32.mrf.mxu1 }
  0xaf   : > { %v327_v18 = vadd.f32 %v326_v56, %v285_v54  ;;  %v341_v19 = vadd.f32 %v340_v57, %v299_v55 }
  0xb4   : > { %v446_v60 = vpop.f32.mrf.mxu2  ;;  %v460_v9 = vpop.f32.mrf.mxu3 }
  0xb6   : > { %v375_v58 = vpop.f32.mrf.mxu0  ;;  %v389_v59 = vpop.f32.mrf.mxu1 }
  0xb7   : > { %v394_v7 = vadd.f32 %v375_v58, %v325_v3  ;;  %v395_v8 = vadd.f32 %v389_v59, %v339_v4 }
  0xb9   : > { %v465_v12 = vadd.f32 %v446_v60, %v394_v7  ;;  %v466_v13 = vadd.f32 %v460_v9, %v395_v8 }
  0xbc   : > { %v448_v63 = vpop.f32.mrf.mxu2  ;;  %v462_v0 = vpop.f32.mrf.mxu3 }
  0xbe   : > { %v377_v61 = vpop.f32.mrf.mxu0  ;;  %v391_v62 = vpop.f32.mrf.mxu1 }
  0xbf   : > { %v396_v26 = vadd.f32 %v377_v61, %v327_v18  ;;  %v397_v27 = vadd.f32 %v391_v62, %v341_v19 }
  0xc1   : > { %v467_v15 = vadd.f32 %v448_v63, %v396_v26  ;;  %v468_v30 = vadd.f32 %v462_v0, %v397_v27 }
  0xc4   : > { %v572_v10 = vpop.f32.mrf.mxu2  ;;  %v586_v11 = vpop.f32.mrf.mxu3 }
  0xc6   : > { %v501_v1 = vpop.f32.mrf.mxu0  ;;  %v515_v2 = vpop.f32.mrf.mxu1 }
  0xc7   : > { %v520_v16 = vadd.f32 %v501_v1, %v465_v12  ;;  %v521_v17 = vadd.f32 %v515_v2, %v466_v13 }
  0xc9   : > { %v591_v20 = vadd.f32 %v572_v10, %v520_v16  ;;  %v592_v21 = vadd.f32 %v586_v11, %v521_v17 }
  0xcc   : > { %v574_v33 = vpop.f32.mrf.mxu2  ;;  %v588_v34 = vpop.f32.mrf.mxu3 }
  0xce   : > { %v503_v5 = vpop.f32.mrf.mxu0  ;;  %v517_v6 = vpop.f32.mrf.mxu1 }
  0xcf   : > { %v522_v35 = vadd.f32 %v503_v5, %v467_v15  ;;  %v523_v36 = vadd.f32 %v517_v6, %v468_v30 }
  0xd1   : > { %v593_v39 = vadd.f32 %v574_v33, %v522_v35  ;;  %v594_v40 = vadd.f32 %v588_v34, %v523_v36 }
  0xd6   : > { %v627_v24 = vpop.f32.mrf.mxu0  ;;  %v641_v25 = vpop.f32.mrf.mxu1 }
  0xd7   : > { %v646_v28 = vadd.f32 %v627_v24, %v591_v20  ;;  %v647_v29 = vadd.f32 %v641_v25, %v592_v21 }
  0xd9   : > { %v656_v31 = vadd.f32 %v652_v22, %v646_v28  ;;  %v657_v32 = vadd.f32 %v653_v23, %v647_v29 }
  0xdb   : > { %v660_v37 = vmax.f32 %v656_v31, 0.0  ;;  %v661_v38 = vmax.f32 %v657_v32, 0.0 }
  0xdd   : > { %664 = vst [vmem:[%s216_s26] sm:$0xff] %v660_v37 }
  0xde   : > { %665 = vst [vmem:[%s216_s26 + $0x8] sm:$0xff] %v661_v38  ;;  %v629_v41 = vpop.f32.mrf.mxu0  ;;  %v643_v42 = vpop.f32.mrf.mxu1 }
  0xdf   : > { %v648_v43 = vadd.f32 %v629_v41, %v593_v39  ;;  %v649_v44 = vadd.f32 %v643_v42, %v594_v40 }
  0xe1   : > { %v658_v45 = vadd.f32 %v652_v22, %v648_v43  ;;  %v659_v46 = vadd.f32 %v653_v23, %v649_v44 }
  0xe3   : > { %v662_v47 = vmax.f32 %v658_v45, 0.0  ;;  %v663_v48 = vmax.f32 %v659_v46, 0.0 }
  0xe5   : > { %666 = vst [vmem:[%s216_s26 + $0x10] sm:$0xff] %v662_v47 }
  0xe6   : > { %667 = vst [vmem:[%s216_s26 + $0x18] sm:$0xff] %v663_v48 }
  0xe7   : > { %947 = shalt.err (!%p944_p9)
}
  0xe8   : > { %s1007_s18 = smov 256   ;;  %s1008_s19 = smov 16  }
  0xe9   : > { %824 = dma.vmem_to_hbm [thread:$0]  (%p1069_p4), %s684_s15, 512, %s686_s30, %s669_s4, %s1007_s18, %s1007_s18, %s1008_s19  }
  0xea PF: > { %p836_p10 = scmp.ge.s32.totalorder %s1002_s17, 2  ;;  %s700_s21 = sand.u32 1, %s982_s12  }
  0xeb   : > { %s701_s23 = scalar_lea.sflag [#allocation4], %s700_s21 }
  0xec   : > { %p831_p11 = pnand %p836_p10, %p1076_p8 }
  0xee   : > { %p832_p12 = pneg %p831_p11 }
  0xf0   : > { %977 = dma.done.wait (%p832_p12), %s701_s23, 512  }
  0xf1   : > { %979 = vsyncadd (%p832_p12), %s701_s23, 4294966784  ;;  %s17_s17 = sadd.s32 1, %s1002_s17   ;;  %s1194_s12 = smov %s986_s13 }
  0xf2   : > { %p14_p13 = scmp.ge.s32.totalorder %s17_s17, 4   ;;  %s1195_s13 = smov %s990_s14 }
  0xf3   : > { %s1196_s14 = smov %s1082_s25  ;;  %s1197_s15 = smov %s998_s16 }
  0xf4   : > { %s1198_s16 = smov %s1200_s20  ;;  %16 = sbr.rel (!%p14_p13) target bundleno = 5 (0x5), region = 76 }
  0xf9   :  { %707 = vsyncpa [#allocation3], 1 }
  0xfa   :  { %709 = vsyncpa [#allocation3 + $0x1], 1 }
  0xfb   :  { %710 = vsyncpa [#allocation4], 1 }
  0xfc   :  { %712 = vsyncpa [#allocation4 + $0x1], 1 }

</bundles_post_ra>
